<compile_context>
chip_gen: v5e
topology: v5e:2x2
jax: 0.10.0
libtpu: 0.0.40
codegen_flags: <defaults>
</compile_context>

<pallas_src>
import functools

import jax
import jax.numpy as jnp
from jax.experimental import pallas as pl
from jax.experimental.pallas import tpu as pltpu

LANE = 128
SUBLANE = 8


def _round_up(n, m):
    return ((n + m - 1) // m) * m


def dqn_kernel(x_ref, w1_ref, b1_ref, w2_ref, b2_ref, w3_ref, b3_ref, o_ref):
    # One (tb, in_f) batch tile; weights/biases are VMEM-resident across grid
    # steps (constant index_map).  MXU accumulates in f32; bias add + ReLU f32.
    x = x_ref[...].astype(w1_ref.dtype)          # cast to bf16 inside the kernel
    h1 = jnp.dot(x, w1_ref[...], preferred_element_type=jnp.float32) + b1_ref[...]
    h1 = jnp.maximum(h1, 0.0)
    h2 = jnp.dot(h1.astype(w2_ref.dtype), w2_ref[...],
                 preferred_element_type=jnp.float32) + b2_ref[...]
    h2 = jnp.maximum(h2, 0.0)
    out = jnp.dot(h2.astype(w3_ref.dtype), w3_ref[...],
                  preferred_element_type=jnp.float32) + b3_ref[...]
    o_ref[...] = out.astype(o_ref.dtype)


def init_params(key, input_size=4, hidden_size=64, num_actions=2):
    """PyTorch nn.Linear-style init; weights stored as (in, out) for x @ W."""
    ks = jax.random.split(key, 6)

    def linear(kw, kb, fan_in, fan_out):
        bound = 1.0 / jnp.sqrt(fan_in)
        w = jax.random.uniform(kw, (fan_in, fan_out), jnp.float32, -bound, bound)
        b = jax.random.uniform(kb, (1, fan_out), jnp.float32, -bound, bound)
        return w, b

    w1, b1 = linear(ks[0], ks[1], input_size, hidden_size)
    w2, b2 = linear(ks[2], ks[3], hidden_size, hidden_size)
    w3, b3 = linear(ks[4], ks[5], hidden_size, num_actions)
    return (w1, b1, w2, b2, w3, b3)


def prepare_params(params, compute_dtype=jnp.bfloat16):
    """Pad hidden dim to 128 lanes and the action head to 8 (sublane) only.

    Padded weight rows/cols and bias entries are zero, so padded hidden
    columns are exactly 0 after ReLU and contribute nothing downstream; the
    wrapper slices the action head back to num_actions.
    """
    w1, b1, w2, b2, w3, b3 = params
    in_f, h = w1.shape
    a = w3.shape[1]
    hp = _round_up(h, LANE)       # hidden: 64 -> 128 (lane-dense matmuls)
    ap = _round_up(a, SUBLANE)    # actions: 2 -> 8   (small output writeback)

    def pad2(m, r, c):
        return jnp.pad(m, ((0, r - m.shape[0]), (0, c - m.shape[1])))

    w1p = pad2(w1, in_f, hp).astype(compute_dtype)
    w2p = pad2(w2, hp, hp).astype(compute_dtype)
    w3p = pad2(w3, hp, ap).astype(compute_dtype)
    b1p = pad2(b1, 1, hp).astype(jnp.float32)
    b2p = pad2(b2, 1, hp).astype(jnp.float32)
    b3p = pad2(b3, 1, ap).astype(jnp.float32)
    return (w1p, b1p, w2p, b2p, w3p, b3p)


@functools.partial(jax.jit, static_argnames=("num_actions", "block_rows"))
def dqn_forward(x, padded_params, num_actions, *, block_rows=2048):
    """Fused DQN MLP on a batch of states x: (B, input_size) -> (B, num_actions)."""
    w1, b1, w2, b2, w3, b3 = padded_params
    B, in_f = x.shape
    hp = w1.shape[1]
    ap = w3.shape[1]

    # Batch tile: multiple of 8, capped at block_rows, and split into >= 2
    # blocks whenever possible so the 'parallel' axis can use both TCs on v7x.
    half = max(SUBLANE, _round_up(pl.cdiv(B, 2), SUBLANE))
    tb = min(_round_up(block_rows, SUBLANE), half)
    grid = (pl.cdiv(B, tb),)   # partial last block handled by Pallas (OOB masked)

    flops = 2 * B * (in_f * hp + hp * hp + hp * ap)
    bytes_accessed = (
        x.size * x.dtype.itemsize
        + sum(int(p.size) * p.dtype.itemsize for p in padded_params)
        + B * ap * 4
    )

    const2d = lambda shape: pl.BlockSpec(shape, lambda i: (0, 0))

    out = pl.pallas_call(
        dqn_kernel,
        out_shape=jax.ShapeDtypeStruct((B, ap), jnp.float32),
        grid=grid,
        in_specs=[
            pl.BlockSpec((tb, in_f), lambda i: (i, 0)),    # x: tiled over batch
            const2d(w1.shape), const2d(b1.shape),           # weights/biases resident
            const2d(w2.shape), const2d(b2.shape),
            const2d(w3.shape), const2d(b3.shape),
        ],
        out_specs=pl.BlockSpec((tb, ap), lambda i: (i, 0)),
        compiler_params=pltpu.CompilerParams(
            dimension_semantics=("parallel",)),
        cost_estimate=pl.CostEstimate(
            flops=flops, transcendentals=0, bytes_accessed=bytes_accessed),
    )(x, w1, b1, w2, b2, w3, b3)

    # Slice away the (zero) padded action columns only.
    return out[:, :num_actions]


def dqn_reference(x, params, compute_dtype=jnp.bfloat16):
    """Pure-JAX reference matching the kernel's mixed-precision compute path.

    Note: relative to the exact PyTorch f32 DQN this introduces bf16 rounding
    on x/W (acceptable for DQN; not bit-matching the original model).
    """
    w1, b1, w2, b2, w3, b3 = params

    def mm(a, w):
        return jnp.dot(a.astype(compute_dtype).astype(jnp.float32),
                       w.astype(compute_dtype).astype(jnp.float32))

    h1 = jnp.maximum(mm(x, w1) + b1, 0.0)
    h2 = jnp.maximum(mm(h1, w2) + b2, 0.0)
    return mm(h2, w3) + b3


if __name__ == "__main__":
    key = jax.random.PRNGKey(0)
    k_params, k_x1, k_x2 = jax.random.split(key, 3)

    input_size, hidden_size, num_actions = 4, 64, 2
    params = init_params(k_params, input_size, hidden_size, num_actions)
    padded_params = prepare_params(params)

    # Small minibatch (matches the original training-loop usage): grid = 1.
    x_small = jax.random.normal(k_x1, (8, input_size), jnp.float32)
    out_small = jax.block_until_ready(
        dqn_forward(x_small, padded_params, num_actions))
    ref_small = dqn_reference(x_small, params)
    assert out_small.shape == (8, num_actions)
    assert jnp.allclose(out_small, ref_small, atol=1e-3, rtol=1e-3)

    # Larger batch exercising multiple grid steps and a partial last block.
    x_big = jax.random.normal(k_x2, (300, input_size), jnp.float32)
    out_big = jax.block_until_ready(
        dqn_forward(x_big, padded_params, num_actions, block_rows=128))
    ref_big = dqn_reference(x_big, params)
    assert out_big.shape == (300, num_actions)
    assert jnp.allclose(out_big, ref_big, atol=1e-3, rtol=1e-3)

    # Default (large) block_rows path: 2 parallel blocks for the v7x megacore.
    out_big2 = jax.block_until_ready(
        dqn_forward(x_big, padded_params, num_actions))
    assert jnp.allclose(out_big2, ref_big, atol=1e-3, rtol=1e-3)

    print("KERNEL_OK")
</pallas_src>

<mosaic_0001>
module attributes {stable_mosaic.version = 11 : i64} {
  func.func @dqn_kernel(%arg0: i32, %arg1: memref<8x4xf32, #tpu.memory_space<vmem>>, %arg2: memref<4x128xbf16, #tpu.memory_space<vmem>>, %arg3: memref<1x128xf32, #tpu.memory_space<vmem>>, %arg4: memref<128x128xbf16, #tpu.memory_space<vmem>>, %arg5: memref<1x128xf32, #tpu.memory_space<vmem>>, %arg6: memref<128x8xbf16, #tpu.memory_space<vmem>>, %arg7: memref<1x8xf32, #tpu.memory_space<vmem>>, %arg8: memref<8x8xf32, #tpu.memory_space<vmem>>) attributes {dimension_semantics = [#tpu.dimension_semantics<parallel>], iteration_bounds = array<i64: 1>, scalar_prefetch = 0 : i64, scratch_operands = 0 : i64, tpu.core_type = #tpu.core_type<tc>, window_params = [{transform_indices = @transform_0, window_bounds = array<i64: 8, 4>}, {pipeline_mode = #tpu.pipeline_mode<synchronous>, transform_indices = @transform_1, window_bounds = array<i64: 4, 128>}, {pipeline_mode = #tpu.pipeline_mode<synchronous>, transform_indices = @transform_2, window_bounds = array<i64: 1, 128>}, {pipeline_mode = #tpu.pipeline_mode<synchronous>, transform_indices = @transform_3, window_bounds = array<i64: 128, 128>}, {pipeline_mode = #tpu.pipeline_mode<synchronous>, transform_indices = @transform_4, window_bounds = array<i64: 1, 128>}, {pipeline_mode = #tpu.pipeline_mode<synchronous>, transform_indices = @transform_5, window_bounds = array<i64: 128, 8>}, {pipeline_mode = #tpu.pipeline_mode<synchronous>, transform_indices = @transform_6, window_bounds = array<i64: 1, 8>}, {transform_indices = @transform_7, window_bounds = array<i64: 8, 8>}]} {
    %c0 = arith.constant 0 : index
    %c0_0 = arith.constant 0 : index
    %0 = vector.load %arg1[%c0, %c0_0] : memref<8x4xf32, #tpu.memory_space<vmem>>, vector<8x4xf32>
    %1 = arith.truncf %0 : vector<8x4xf32> to vector<8x4xbf16>
    %c0_1 = arith.constant 0 : index
    %c0_2 = arith.constant 0 : index
    %2 = vector.load %arg2[%c0_1, %c0_2] : memref<4x128xbf16, #tpu.memory_space<vmem>>, vector<4x128xbf16>
    %cst = arith.constant dense<0.000000e+00> : vector<8x128xf32>
    %3 = tpu.matmul %1, %2, %cst {dimension_numbers = #tpu.dot_dimension_numbers<[1], [0], [0], [1], [0, 0, 1, 1], [], []>} : vector<8x4xbf16>, vector<4x128xbf16>, vector<8x128xf32> -> vector<8x128xf32>
    %c0_3 = arith.constant 0 : index
    %c0_4 = arith.constant 0 : index
    %4 = vector.load %arg3[%c0_3, %c0_4] : memref<1x128xf32, #tpu.memory_space<vmem>>, vector<1x128xf32>
    %5 = vector.broadcast %4 : vector<1x128xf32> to vector<8x128xf32>
    %6 = arith.addf %3, %5 : vector<8x128xf32>
    %cst_5 = arith.constant 0.000000e+00 : f32
    %7 = vector.broadcast %cst_5 : f32 to vector<8x128xf32>
    %8 = arith.maximumf %6, %7 : vector<8x128xf32>
    %9 = arith.truncf %8 : vector<8x128xf32> to vector<8x128xbf16>
    %c0_6 = arith.constant 0 : index
    %c0_7 = arith.constant 0 : index
    %10 = vector.load %arg4[%c0_6, %c0_7] : memref<128x128xbf16, #tpu.memory_space<vmem>>, vector<128x128xbf16>
    %cst_8 = arith.constant dense<0.000000e+00> : vector<8x128xf32>
    %11 = tpu.matmul %9, %10, %cst_8 {dimension_numbers = #tpu.dot_dimension_numbers<[1], [0], [0], [1], [0, 0, 1, 1], [], []>} : vector<8x128xbf16>, vector<128x128xbf16>, vector<8x128xf32> -> vector<8x128xf32>
    %c0_9 = arith.constant 0 : index
    %c0_10 = arith.constant 0 : index
    %12 = vector.load %arg5[%c0_9, %c0_10] : memref<1x128xf32, #tpu.memory_space<vmem>>, vector<1x128xf32>
    %13 = vector.broadcast %12 : vector<1x128xf32> to vector<8x128xf32>
    %14 = arith.addf %11, %13 : vector<8x128xf32>
    %cst_11 = arith.constant 0.000000e+00 : f32
    %15 = vector.broadcast %cst_11 : f32 to vector<8x128xf32>
    %16 = arith.maximumf %14, %15 : vector<8x128xf32>
    %17 = arith.truncf %16 : vector<8x128xf32> to vector<8x128xbf16>
    %c0_12 = arith.constant 0 : index
    %c0_13 = arith.constant 0 : index
    %18 = vector.load %arg6[%c0_12, %c0_13] : memref<128x8xbf16, #tpu.memory_space<vmem>>, vector<128x8xbf16>
    %cst_14 = arith.constant dense<0.000000e+00> : vector<8x8xf32>
    %19 = tpu.matmul %17, %18, %cst_14 {dimension_numbers = #tpu.dot_dimension_numbers<[1], [0], [0], [1], [0, 0, 1, 1], [], []>} : vector<8x128xbf16>, vector<128x8xbf16>, vector<8x8xf32> -> vector<8x8xf32>
    %c0_15 = arith.constant 0 : index
    %c0_16 = arith.constant 0 : index
    %20 = vector.load %arg7[%c0_15, %c0_16] : memref<1x8xf32, #tpu.memory_space<vmem>>, vector<1x8xf32>
    %21 = vector.broadcast %20 : vector<1x8xf32> to vector<8x8xf32>
    %22 = arith.addf %19, %21 : vector<8x8xf32>
    %c0_17 = arith.constant 0 : index
    %c0_18 = arith.constant 0 : index
    %23 = vector.load %arg8[%c0_17, %c0_18] : memref<8x8xf32, #tpu.memory_space<vmem>>, vector<8x8xf32>
    tpu.vector_store %arg8[%c0_17, %c0_18], %22 {strides = array<i32>} : memref<8x8xf32, #tpu.memory_space<vmem>>, vector<8x8xf32>,
    return
  }
  func.func @transform_0(%arg0: i32) -> (i32, i32) {
    %c0_i32 = arith.constant 0 : i32
    %c0_i32_0 = arith.constant 0 : i32
    return %arg0, %c0_i32 : i32, i32
  }
  func.func @transform_1(%arg0: i32) -> (i32, i32) {
    %c0_i32 = arith.constant 0 : i32
    %c0_i32_0 = arith.constant 0 : i32
    %c0_i32_1 = arith.constant 0 : i32
    return %c0_i32, %c0_i32_0 : i32, i32
  }
  func.func @transform_2(%arg0: i32) -> (i32, i32) {
    %c0_i32 = arith.constant 0 : i32
    %c0_i32_0 = arith.constant 0 : i32
    %c0_i32_1 = arith.constant 0 : i32
    return %c0_i32, %c0_i32_0 : i32, i32
  }
  func.func @transform_3(%arg0: i32) -> (i32, i32) {
    %c0_i32 = arith.constant 0 : i32
    %c0_i32_0 = arith.constant 0 : i32
    %c0_i32_1 = arith.constant 0 : i32
    return %c0_i32, %c0_i32_0 : i32, i32
  }
  func.func @transform_4(%arg0: i32) -> (i32, i32) {
    %c0_i32 = arith.constant 0 : i32
    %c0_i32_0 = arith.constant 0 : i32
    %c0_i32_1 = arith.constant 0 : i32
    return %c0_i32, %c0_i32_0 : i32, i32
  }
  func.func @transform_5(%arg0: i32) -> (i32, i32) {
    %c0_i32 = arith.constant 0 : i32
    %c0_i32_0 = arith.constant 0 : i32
    %c0_i32_1 = arith.constant 0 : i32
    return %c0_i32, %c0_i32_0 : i32, i32
  }
  func.func @transform_6(%arg0: i32) -> (i32, i32) {
    %c0_i32 = arith.constant 0 : i32
    %c0_i32_0 = arith.constant 0 : i32
    %c0_i32_1 = arith.constant 0 : i32
    return %c0_i32, %c0_i32_0 : i32, i32
  }
  func.func @transform_7(%arg0: i32) -> (i32, i32) {
    %c0_i32 = arith.constant 0 : i32
    %c0_i32_0 = arith.constant 0 : i32
    return %arg0, %c0_i32 : i32, i32
  }
}

</mosaic_0001>

<bundles_post_ra>
// kernel: dqn_forward.1
= control target key start
LH: loop header
LB: loop body
LE: loop exit
PB: predicated region body
PF: predicated region fallthrough
CT: control target
= control target key end

     0   :  { %vm38_vm0 = vcmask 1041408   ;;  %vm34_vm1 = vcmask 31744   ;;  %vm221_vm2 = vcmask 64512   ;;  %s417_s1 = inlined_call_operand.vmem [shape: bf16[4,128], index: 1, kind: input, shape index: {}]   ;;  %s418_s0 = inlined_call_operand.vmem [shape: f32[8,4], index: 0, kind: input, shape index: {}]   ;;  %s419_s3 = inlined_call_operand.vmem [shape: bf16[128,128], index: 3, kind: input, shape index: {}]   ;;  %s420_s2 = inlined_call_operand.vmem [shape: f32[1,128], index: 2, kind: input, shape index: {}]   ;;  %s421_s4 = inlined_call_operand.vmem [shape: f32[1,128], index: 4, kind: input, shape index: {}]   ;;  %s422_s5 = inlined_call_operand.vmem [shape: bf16[128,8], index: 5, kind: input, shape index: {}]   ;;  %s423_s6 = inlined_call_operand.vmem [shape: f32[1,8], index: 6, kind: input, shape index: {}]   ;;  %s424_s7 = inlined_call_operand.vmem [shape: f32[8,8], index: 7, kind: output, shape index: {}]  }
   0x1   :  { %v29_v0 = vld [vmem:[%s417_s1] sm:$0x3]  ;;  %v299_v2 = vld [vmem:[%s419_s3 + $0x38] sm:$0xff]  ;;  %v298_v5 = vld [vmem:[%s419_s3 + $0x30] sm:$0xff] }
   0x2   :  { %v27_v1 = vld [vmem:[%s418_s0] sm:$0xff]  ;;  %v40_v3 = vsel %vm38_vm0, %v29_v0, 0  ;;  %125 = vmatpush.bf16.msra.mxu1 %v299_v2  ;;  %v297_v6 = vld [vmem:[%s419_s3 + $0x28] sm:$0xff]  ;;  %v295_v8 = vld [vmem:[%s419_s3 + $0x18] sm:$0xff] }
   0x3   :  { %v28_v4 = vpack.c.bf16 %v27_v1, %v27_v1  ;;  %49 = vmatpush.bf16.msra.mxu0 %v40_v3  ;;  %v296_v7 = vld [vmem:[%s419_s3 + $0x20] sm:$0xff]  ;;  %v294_v9 = vld [vmem:[%s419_s3 + $0x10] sm:$0xff]  ;;  %v293_v10 = vld [vmem:[%s419_s3 + $0x8] sm:$0xff] }
   0x4   :  { %v292_v11 = vld [vmem:[%s419_s3] sm:$0xff]  ;;  %v307_v12 = vld [vmem:[%s422_s5 + $0x38] sm:$0xff]  ;;  %v306_v13 = vld [vmem:[%s422_s5 + $0x30] sm:$0xff] }
   0x5   :  { %208 = vmatpush.bf16.msra.mxu2 %v307_v12  ;;  %v305_v14 = vld [vmem:[%s422_s5 + $0x28] sm:$0xff]  ;;  %v304_v15 = vld [vmem:[%s422_s5 + $0x20] sm:$0xff]  ;;  %v303_v16 = vld [vmem:[%s422_s5 + $0x18] sm:$0xff] }
   0x6   :  { %227 = vmatmul.msk.bf16.vlgmr.msra.gmra.mxu0 %vm34_vm1, %v28_v4  ;;  %126 = vmatpush.bf16.msra.mxu1 %v298_v5  ;;  %v302_v17 = vld [vmem:[%s422_s5 + $0x10] sm:$0xff]  ;;  %v308_v18 = vld [vmem:[%s420_s2] ss:$0 sm:$0xff]  ;;  %v301_v24 = vld [vmem:[%s422_s5 + $0x8] sm:$0xff] }
   0x7   :  { %v300_v25 = vld [vmem:[%s422_s5] sm:$0xff] }
   0x8   :  { %v309_v26 = vld [vmem:[%s421_s4] ss:$0 sm:$0xff] }
   0x9   :  { %209 = vmatpush.bf16.msra.mxu2 %v306_v13  ;;  %v310_v32 = vld [vmem:[%s423_s6] ss:$0 sm:$0xff] }
   0xa   :  { %127 = vmatpush.bf16.msra.mxu1 %v297_v6 }
   0xd   :  { %210 = vmatpush.bf16.msra.mxu2 %v305_v14 }
   0xe   :  { %128 = vmatpush.bf16.msra.mxu1 %v296_v7 }
  0x11   :  { %211 = vmatpush.bf16.msra.mxu2 %v304_v15 }
  0x12   :  { %129 = vmatpush.bf16.msra.mxu1 %v295_v8 }
  0x15   :  { %212 = vmatpush.bf16.msra.mxu2 %v303_v16 }
  0x16   :  { %130 = vmatpush.bf16.msra.mxu1 %v294_v9 }
  0x19   :  { %213 = vmatpush.bf16.msra.mxu2 %v302_v17 }
  0x1a   :  { %131 = vmatpush.bf16.msra.mxu1 %v293_v10 }
  0x1d   :  { %214 = vmatpush.bf16.msra.mxu2 %v301_v24 }
  0x1e   :  { %132 = vmatpush.bf16.msra.mxu1 %v292_v11 }
  0x21   :  { %215 = vmatpush.bf16.msra.mxu2 %v300_v25 }
  0x83   :  { %v51_v19 = vpop.f32.mrf.mxu0 }
  0x84   :  { %v52_v20 = vadd.f32 %v308_v18, %v51_v19 }
  0x86   :  { %v55_v21 = vmax.f32 %v52_v20, 0.0 }
  0x88   :  { %v56_v22 = vpack.c.bf16 %v55_v21, %v55_v21 }
  0x8a   :  { %133 = vmatmul.bf16.vlgmr.msra.gmra.mxu1 %v56_v22 }
  0x8b   :  { %v53_v23 = vpop.f32.mrf.mxu0 }
 0x107   :  { %v134_v27 = vpop.f32.mrf.mxu1 }
 0x108   :  { %v135_v28 = vadd.f32 %v309_v26, %v134_v27 }
 0x10a   :  { %v138_v29 = vmax.f32 %v135_v28, 0.0 }
 0x10c   :  { %v139_v30 = vpack.c.bf16 %v138_v29, %v138_v29 }
 0x10e   :  { %216 = vmatmul.bf16.vlgmr.msra.gmra.mxu2 %v139_v30 }
 0x10f   :  { %v136_v31 = vpop.f32.mrf.mxu1 }
 0x191   :  { %v217_v33 = vpop.f32.mrf.mxu2 }
 0x192   :  { %v218_v34 = vadd.f32 %v310_v32, %v217_v33 }
 0x194   :  { %222 = vst.msk [vmem:[%s424_s7] sm:$0xff] %vm221_vm2, %v218_v34 }
 0x199   :  { %v219_v35 = vpop.f32.mrf.mxu2 }

</bundles_post_ra>
